<compile_context>
chip_gen: v7x
topology: tpu7x:2x2x1
jax: 0.10.0
libtpu: 0.0.40
codegen_flags: <defaults>
</compile_context>

<pallas_src>
import functools
import math

import jax
import jax.numpy as jnp
from jax import lax
from jax.experimental import pallas as pl
from jax.experimental.pallas import tpu as pltpu

EPS = 1e-6
NUM_GROUPS = 32
KV_CHUNK = 512          # kv-tile width for the in-kernel online-softmax loop


# ---------------------------------------------------------------------------
# Kernel
# ---------------------------------------------------------------------------
def _attn_kernel(x_ref, m_ref, mt_ref, gamma_ref, beta_ref,
                 wqkv_ref, bqkv_ref, wp_ref, bp_ref, o_ref,
                 *, kv_chunk, bf16_exp):
    NB, C, P = x_ref.shape
    G = m_ref.shape[1]
    Cp = wqkv_ref.shape[1] // 3                       # 128-padded segment width
    n = float(P * (C // G))                           # elements per group

    # x arrives in torch NCP layout; one in-kernel transpose (XLU) replaces two
    # full HBM relayout passes in the wrapper.
    x = jnp.transpose(x_ref[...], (0, 2, 1))          # (NB, P, C) f32

    # ---- GroupNorm(32, C, eps=1e-6, affine): centered two-pass, all f32 ----
    M = m_ref[...]                                    # (C, G) one-hot membership
    MT = mt_ref[...]                                  # (G, C)
    s1 = jnp.sum(x, axis=1)                                           # (NB, C)
    gmean = jnp.dot(s1, M, preferred_element_type=jnp.float32) / n    # (NB, G)
    mean_c = jnp.dot(gmean, MT, preferred_element_type=jnp.float32)   # (NB, C)
    d = x - mean_c[:, None, :]
    s2 = jnp.sum(d * d, axis=1)                                       # (NB, C)
    gvar = jnp.dot(s2, M, preferred_element_type=jnp.float32) / n     # (NB, G)
    var_c = jnp.dot(gvar, MT, preferred_element_type=jnp.float32)     # (NB, C)
    inv = lax.rsqrt(var_c + EPS)
    h = d * (inv * gamma_ref[...])[:, None, :] + beta_ref[...][None]
    # The transposed x copy and d die here; the residual re-reads x_ref below.

    # ---- fused q/k/v projection: one bf16 MXU pass with M = NB*P rows ------
    h2 = h.reshape(NB * P, C).astype(jnp.bfloat16)
    qkv = (jnp.dot(h2, wqkv_ref[...], preferred_element_type=jnp.float32)
           + bqkv_ref[...]).astype(jnp.bfloat16)      # single bf16 cast
    qkv = qkv.reshape(NB, P, 3 * Cp)
    # 1/sqrt(C) pre-folded into the q weights/bias; padded lanes are zero; the
    # slices are lane-tile aligned (Cp % 128 == 0) so no relayout copies.
    q = qkv[:, :, :Cp]
    k = qkv[:, :, Cp:2 * Cp]
    v = qkv[:, :, 2 * Cp:]

    def chunk_probs(s, m_row):
        # exp + f32-accumulated row-sum. bf16 EUP exp on v6e/v7x; f32 on v5e.
        if bf16_exp:
            p = jnp.exp((s - m_row).astype(jnp.bfloat16))
            l_add = jnp.sum(p, axis=-1, keepdims=True, dtype=jnp.float32)
        else:
            p32 = jnp.exp(s - m_row)
            l_add = jnp.sum(p32, axis=-1, keepdims=True)
            p = p32.astype(jnp.bfloat16)
        return p, l_add

    n_chunks = -(-P // kv_chunk)
    if n_chunks == 1:
        # Small/medium P: single full-width pass, no online rescaling.
        s = lax.dot_general(q, k, (((2,), (2,)), ((0,), (0,))),
                            preferred_element_type=jnp.float32)       # (NB,P,P)
        m_i = jnp.max(s, axis=-1, keepdims=True)
        p, l_i = chunk_probs(s, m_i)
        acc = lax.dot_general(p, v, (((2,), (1,)), ((0,), (0,))),
                              preferred_element_type=jnp.float32)     # (NB,P,Cp)
    else:
        # Flash-style kv tiling with an online-softmax accumulator: never
        # materializes the full (P, P) scores, only (P, kv_chunk) tiles.
        # TODO(synk): for extreme P (q/k/v themselves overflow VMEM) this also
        # needs q tiling across a grid axis, not just in-kernel kv chunks.
        m_i = jnp.full((NB, P, 1), -jnp.inf, jnp.float32)
        l_i = jnp.zeros((NB, P, 1), jnp.float32)
        acc = jnp.zeros((NB, P, Cp), jnp.float32)
        for c in range(n_chunks):
            lo, hi = c * kv_chunk, min((c + 1) * kv_chunk, P)
            kc = k[:, lo:hi, :]
            vc = v[:, lo:hi, :]
            s = lax.dot_general(q, kc, (((2,), (2,)), ((0,), (0,))),
                                preferred_element_type=jnp.float32)   # (NB,P,hi-lo)
            m_new = jnp.maximum(m_i, jnp.max(s, axis=-1, keepdims=True))
            p, l_add = chunk_probs(s, m_new)
            alpha = jnp.exp(m_i - m_new)                              # f32
            l_i = alpha * l_i + l_add
            acc = alpha * acc + lax.dot_general(
                p, vc, (((2,), (1,)), ((0,), (0,))),
                preferred_element_type=jnp.float32)
            m_i = m_new

    # Deferred softmax normalization: exact reciprocal on a (NB, P, 1) tensor.
    attn = acc * pl.reciprocal(l_i, approx=False)

    # ---- output projection + residual (residual re-reads the x block) ------
    o = jnp.dot(attn.reshape(NB * P, Cp).astype(jnp.bfloat16), wp_ref[...],
                preferred_element_type=jnp.float32) + bp_ref[...]     # (NB*P, C)
    o_ref[...] = x_ref[...] + jnp.transpose(o.reshape(NB, P, C), (0, 2, 1))


# ---------------------------------------------------------------------------
# Tiling heuristics (shared between the picker and the vmem limit)
# ---------------------------------------------------------------------------
def _per_step_vmem_bytes(NB, P, C, Cp, G, kvc, weight_bufs=1):
    """Rough per-grid-step VMEM working set for the kernel above."""
    f32, bf16 = 4, 2
    blocks = 2 * 2 * NB * C * P * f32                     # x & out, double-buffered
    weights = weight_bufs * ((3 * C * Cp + Cp * C) * bf16
                             + (2 * C * G + 3 * Cp + 4 * C) * f32)
    act = 3 * NB * P * C * f32                            # x^T / h / o
    act += NB * P * 3 * Cp * (f32 + bf16)                 # fused qkv f32 + bf16
    act += 2 * NB * P * Cp * f32                          # acc + p@v partial
    act += NB * P * kvc * (f32 + bf16)                    # scores + probs chunk
    act += 3 * NB * P * 128 * f32                         # m / l / alpha (lane-padded)
    return blocks + weights + act


def _chip_info():
    """(vmem capacity bytes, is_v5e); conservative defaults if queries fail."""
    vmem_cap, is_v5e = 64 << 20, False
    try:
        vmem_cap = int(pltpu.get_tpu_info().vmem_capacity_bytes)
    except Exception:
        pass
    try:
        kind = jax.devices()[0].device_kind.lower()
        is_v5e = ("v5e" in kind) or ("v5 lite" in kind) or ("v5lite" in kind)
    except Exception:
        pass
    return vmem_cap, is_v5e


def _pick_block_batch(B, P, C, Cp, G, kvc, budget, min_m, target_steps=4):
    """Largest NB (divisor of B) that fits the VMEM budget while keeping
    >= target_steps grid steps (pipeline overlap + 2-TC sharding, prefer an
    even step count) and, when possible, an MXU M of at least min_m rows."""
    divisors = [d for d in range(1, B + 1) if B % d == 0]
    fits = [d for d in divisors
            if _per_step_vmem_bytes(d, P, C, Cp, G, kvc) <= budget]
    if not fits:
        return 1                 # even NB=1 overshoots; rely on vmem_limit headroom
    pipelined = [d for d in fits if B // d >= min(target_steps, B)]
    cands = [d for d in pipelined if d * P >= min_m] or pipelined
    even = [d for d in cands if (B // d) % 2 == 0]
    return max(even or cands)


# ---------------------------------------------------------------------------
# Wrapper
# ---------------------------------------------------------------------------
def spatial_self_attention(x_ncp, params, *, block_batch=None, kv_chunk=None):
    """x_ncp: (B, C, P) float32 (torch Conv1d layout). Returns (B, C, P)."""
    B, C, P = x_ncp.shape
    G = NUM_GROUPS
    assert C % G == 0, "in_channels must be divisible by 32 (GroupNorm groups)"

    Cp = -(-C // 128) * 128            # pad each q/k/v segment to a lane-tile multiple
    vmem_cap, is_v5e = _chip_info()
    kvc = int(kv_chunk) if kv_chunk is not None else min(P, KV_CHUNK)

    budget = int(vmem_cap * (0.30 if vmem_cap <= (64 << 20) else 0.40))
    min_m = 512 if is_v5e else 256
    NB = int(block_batch) if block_batch is not None else _pick_block_batch(
        B, P, C, Cp, G, kvc, budget, min_m)
    assert B % NB == 0
    steps = B // NB

    # TODO(synk): for production, keep activations in NPC across the model so
    # even the in-kernel transposes disappear.
    x_f32 = x_ncp.astype(jnp.float32)

    # One-hot group-membership matrix (exact selector; GroupNorm stats in f32).
    ch = jnp.arange(C)
    M = (ch[:, None] // (C // G) == jnp.arange(G)[None, :]).astype(jnp.float32)
    MT = M.T

    gamma = params["gamma"].reshape(1, C).astype(jnp.float32)
    beta = params["beta"].reshape(1, C).astype(jnp.float32)

    # Conv1d weights are (C_out, C_in) -> pre-transpose to (C_in, C_out), fold
    # the attention scale into q, zero-pad each segment to Cp lanes, fuse into
    # one (C, 3*Cp) bf16 operand.  Zero padding keeps the math exact.
    scale = float(C) ** -0.5
    pad_w = lambda w: jnp.pad(w, ((0, 0), (0, Cp - C)))
    pad_b = lambda b: jnp.pad(b, (0, Cp - C))
    w_qkv = jnp.concatenate(
        [pad_w(params["wq"].T * scale), pad_w(params["wk"].T), pad_w(params["wv"].T)],
        axis=1).astype(jnp.bfloat16)                                    # (C, 3*Cp)
    b_qkv = jnp.concatenate(
        [pad_b(params["bq"] * scale), pad_b(params["bk"]), pad_b(params["bv"])]
    ).reshape(1, 3 * Cp).astype(jnp.float32)
    w_p = jnp.pad(params["wp"].T, ((0, Cp - C), (0, 0))).astype(jnp.bfloat16)  # (Cp, C)
    b_p = params["bp"].reshape(1, C).astype(jnp.float32)

    need = _per_step_vmem_bytes(NB, P, C, Cp, G, kvc, weight_bufs=2)
    vmem_limit = int(min(max(need * 5 // 4, 32 << 20), vmem_cap * 9 // 10))

    kernel = functools.partial(_attn_kernel, kv_chunk=kvc, bf16_exp=not is_v5e)

    def build(single_buffer_weights):
        def const_spec(shape):
            kw = {}
            if single_buffer_weights:
                # Grid-invariant operands: skip the default double buffer.
                kw["pipeline_mode"] = pl.Buffered(1)
            return pl.BlockSpec(shape, lambda b: (0, 0), **kw)

        return pl.pallas_call(
            kernel,
            out_shape=jax.ShapeDtypeStruct((B, C, P), jnp.float32),
            grid=(steps,),
            in_specs=[
                pl.BlockSpec((NB, C, P), lambda b: (b, 0, 0)),     # x (torch NCP)
                const_spec((C, G)), const_spec((G, C)),            # M, M^T
                const_spec((1, C)), const_spec((1, C)),            # gamma, beta
                const_spec((C, 3 * Cp)), const_spec((1, 3 * Cp)),  # fused qkv w, b
                const_spec((Cp, C)), const_spec((1, C)),           # proj w, b
            ],
            out_specs=pl.BlockSpec((NB, C, P), lambda b: (b, 0, 0)),
            compiler_params=pltpu.CompilerParams(
                dimension_semantics=("parallel",),   # batch blocks -> megacore
                vmem_limit_bytes=vmem_limit),
        )

    args = (x_f32, M, MT, gamma, beta, w_qkv, b_qkv, w_p, b_p)
    try:
        return build(single_buffer_weights=True)(*args)
    except (TypeError, ValueError, NotImplementedError, pltpu.LoweringException):
        # Only the pl.Buffered(1) buffering hint differs from the fallback, so
        # any genuine kernel/spec error reproduces (and surfaces) there.
        return build(single_buffer_weights=False)(*args)


# ---------------------------------------------------------------------------
# Plain-JAX reference (mirrors the torch forward) and test harness
# ---------------------------------------------------------------------------
def _reference(x_ncp, params):
    B, C, P = x_ncp.shape
    G = NUM_GROUPS
    x = x_ncp.astype(jnp.float32)
    xg = x.reshape(B, G, C // G, P)
    mean = xg.mean(axis=(2, 3), keepdims=True)
    var = ((xg - mean) ** 2).mean(axis=(2, 3), keepdims=True)
    h = ((xg - mean) / jnp.sqrt(var + EPS)).reshape(B, C, P)
    h = h * params["gamma"][None, :, None] + params["beta"][None, :, None]

    conv = lambda w, b, t: jnp.einsum(
        "oc,bcp->bop", w, t, precision=lax.Precision.HIGHEST) + b[None, :, None]
    q = conv(params["wq"], params["bq"], h)
    k = conv(params["wk"], params["bk"], h)
    v = conv(params["wv"], params["bv"], h)
    qT = jnp.transpose(q, (0, 2, 1))                                    # (B, P, C)
    w_ = jnp.einsum("bij,bjk->bik", qT, k,
                    precision=lax.Precision.HIGHEST) * (C ** -0.5)      # (B, P, P)
    w_ = jax.nn.softmax(w_, axis=2)
    w_t = jnp.transpose(w_, (0, 2, 1))
    h_ = jnp.einsum("bij,bjk->bik", v, w_t, precision=lax.Precision.HIGHEST)
    h_ = conv(params["wp"], params["bp"], h_)
    return x + h_


def _init_params(key, C):
    bound = 1.0 / math.sqrt(C)
    ks = jax.random.split(key, 10)
    u = lambda k, shape: jax.random.uniform(k, shape, jnp.float32, -bound, bound)
    return {
        "gamma": 1.0 + 0.1 * jax.random.normal(ks[0], (C,), jnp.float32),
        "beta": 0.1 * jax.random.normal(ks[1], (C,), jnp.float32),
        "wq": u(ks[2], (C, C)), "bq": u(ks[3], (C,)),
        "wk": u(ks[4], (C, C)), "bk": u(ks[5], (C,)),
        "wv": u(ks[6], (C, C)), "bv": u(ks[7], (C,)),
        "wp": u(ks[8], (C, C)), "bp": u(ks[9], (C,)),
    }


if __name__ == "__main__":
    key = jax.random.PRNGKey(0)

    # Case 1: small shape (C divisible by 32), single-chunk attention path,
    # exercises the Cp lane padding (C=64 -> Cp=128) and the in-kernel
    # NCP<->NPC transposes.
    B, C, P = 2, 64, 16
    kx, kp, key = jax.random.split(key, 3)
    x = jax.random.normal(kx, (B, C, P), jnp.float32)
    params = _init_params(kp, C)
    out = jax.block_until_ready(spatial_self_attention(x, params))
    ref = _reference(x, params)
    assert out.shape == (B, C, P)
    # bf16 MXU/EUP operands vs f32 HIGHEST reference -> loose tolerance.
    assert jnp.allclose(out, ref, atol=3e-2, rtol=3e-2), "mismatch (small shape)"

    # Case 2: forces the flash-style kv-chunked online-softmax path.
    B2, C2, P2 = 2, 64, 256
    kx2, kp2 = jax.random.split(key)
    x2 = jax.random.normal(kx2, (B2, C2, P2), jnp.float32)
    params2 = _init_params(kp2, C2)
    out2 = jax.block_until_ready(
        spatial_self_attention(x2, params2, kv_chunk=64))
    ref2 = _reference(x2, params2)
    assert out2.shape == (B2, C2, P2)
    assert jnp.allclose(out2, ref2, atol=3e-2, rtol=3e-2), "mismatch (kv-chunked)"

    print("KERNEL_OK")
</pallas_src>

<mosaic_0001>
module attributes {stable_mosaic.version = 11 : i64} {
  func.func @_attn_kernel(%arg0: i32, %arg1: memref<1x64x16xf32, #tpu.memory_space<vmem>>, %arg2: memref<64x32xf32, #tpu.memory_space<vmem>>, %arg3: memref<32x64xf32, #tpu.memory_space<vmem>>, %arg4: memref<1x64xf32, #tpu.memory_space<vmem>>, %arg5: memref<1x64xf32, #tpu.memory_space<vmem>>, %arg6: memref<64x384xbf16, #tpu.memory_space<vmem>>, %arg7: memref<1x384xf32, #tpu.memory_space<vmem>>, %arg8: memref<128x64xbf16, #tpu.memory_space<vmem>>, %arg9: memref<1x64xf32, #tpu.memory_space<vmem>>, %arg10: memref<1x64x16xf32, #tpu.memory_space<vmem>>) attributes {dimension_semantics = [#tpu.dimension_semantics<parallel>], iteration_bounds = array<i64: 2>, scalar_prefetch = 0 : i64, scratch_operands = 0 : i64, tpu.core_type = #tpu.core_type<tc>, window_params = [{transform_indices = @transform_0, window_bounds = array<i64: 1, 64, 16>}, {pipeline_mode = #tpu.pipeline_mode<synchronous>, transform_indices = @transform_1, window_bounds = array<i64: 64, 32>}, {pipeline_mode = #tpu.pipeline_mode<synchronous>, transform_indices = @transform_2, window_bounds = array<i64: 32, 64>}, {pipeline_mode = #tpu.pipeline_mode<synchronous>, transform_indices = @transform_3, window_bounds = array<i64: 1, 64>}, {pipeline_mode = #tpu.pipeline_mode<synchronous>, transform_indices = @transform_4, window_bounds = array<i64: 1, 64>}, {pipeline_mode = #tpu.pipeline_mode<synchronous>, transform_indices = @transform_5, window_bounds = array<i64: 64, 384>}, {pipeline_mode = #tpu.pipeline_mode<synchronous>, transform_indices = @transform_6, window_bounds = array<i64: 1, 384>}, {pipeline_mode = #tpu.pipeline_mode<synchronous>, transform_indices = @transform_7, window_bounds = array<i64: 128, 64>}, {pipeline_mode = #tpu.pipeline_mode<synchronous>, transform_indices = @transform_8, window_bounds = array<i64: 1, 64>}, {transform_indices = @transform_9, window_bounds = array<i64: 1, 64, 16>}]} {
    %c0 = arith.constant 0 : index
    %c0_0 = arith.constant 0 : index
    %c0_1 = arith.constant 0 : index
    %0 = vector.load %arg1[%c0, %c0_0, %c0_1] : memref<1x64x16xf32, #tpu.memory_space<vmem>>, vector<1x64x16xf32>
    %1 = tpu.transpose %0, [0, 2, 1] : vector<1x64x16xf32> -> vector<1x16x64xf32>
    %c0_2 = arith.constant 0 : index
    %c0_3 = arith.constant 0 : index
    %2 = vector.load %arg2[%c0_2, %c0_3] : memref<64x32xf32, #tpu.memory_space<vmem>>, vector<64x32xf32>
    %c0_4 = arith.constant 0 : index
    %c0_5 = arith.constant 0 : index
    %3 = vector.load %arg3[%c0_4, %c0_5] : memref<32x64xf32, #tpu.memory_space<vmem>>, vector<32x64xf32>
    %cst = arith.constant dense<0.000000e+00> : vector<1x64xf32>
    %4 = vector.multi_reduction <add>, %1, %cst [1] : vector<1x16x64xf32> to vector<1x64xf32>
    %cst_6 = arith.constant dense<0.000000e+00> : vector<1x32xf32>
    %5 = tpu.matmul %4, %2, %cst_6 {dimension_numbers = #tpu.dot_dimension_numbers<[1], [0], [0], [1], [0, 0, 1, 1], [], []>} : vector<1x64xf32>, vector<64x32xf32>, vector<1x32xf32> -> vector<1x32xf32>
    %cst_7 = arith.constant 3.200000e+01 : f32
    %6 = vector.broadcast %cst_7 : f32 to vector<1x32xf32>
    %7 = arith.divf %5, %6 : vector<1x32xf32>
    %cst_8 = arith.constant dense<0.000000e+00> : vector<1x64xf32>
    %8 = tpu.matmul %7, %3, %cst_8 {dimension_numbers = #tpu.dot_dimension_numbers<[1], [0], [0], [1], [0, 0, 1, 1], [], []>} : vector<1x32xf32>, vector<32x64xf32>, vector<1x64xf32> -> vector<1x64xf32>
    %9 = vector.shape_cast %8 : vector<1x64xf32> to vector<1x1x64xf32>
    %10 = vector.broadcast %9 : vector<1x1x64xf32> to vector<1x16x64xf32>
    %11 = arith.subf %1, %10 : vector<1x16x64xf32>
    %12 = arith.mulf %11, %11 : vector<1x16x64xf32>
    %cst_9 = arith.constant dense<0.000000e+00> : vector<1x64xf32>
    %13 = vector.multi_reduction <add>, %12, %cst_9 [1] : vector<1x16x64xf32> to vector<1x64xf32>
    %cst_10 = arith.constant dense<0.000000e+00> : vector<1x32xf32>
    %14 = tpu.matmul %13, %2, %cst_10 {dimension_numbers = #tpu.dot_dimension_numbers<[1], [0], [0], [1], [0, 0, 1, 1], [], []>} : vector<1x64xf32>, vector<64x32xf32>, vector<1x32xf32> -> vector<1x32xf32>
    %cst_11 = arith.constant 3.200000e+01 : f32
    %15 = vector.broadcast %cst_11 : f32 to vector<1x32xf32>
    %16 = arith.divf %14, %15 : vector<1x32xf32>
    %cst_12 = arith.constant dense<0.000000e+00> : vector<1x64xf32>
    %17 = tpu.matmul %16, %3, %cst_12 {dimension_numbers = #tpu.dot_dimension_numbers<[1], [0], [0], [1], [0, 0, 1, 1], [], []>} : vector<1x32xf32>, vector<32x64xf32>, vector<1x64xf32> -> vector<1x64xf32>
    %cst_13 = arith.constant 9.99999997E-7 : f32
    %18 = vector.broadcast %cst_13 : f32 to vector<1x64xf32>
    %19 = arith.addf %17, %18 : vector<1x64xf32>
    %20 = math.rsqrt %19 : vector<1x64xf32>
    %c0_14 = arith.constant 0 : index
    %c0_15 = arith.constant 0 : index
    %21 = vector.load %arg4[%c0_14, %c0_15] : memref<1x64xf32, #tpu.memory_space<vmem>>, vector<1x64xf32>
    %22 = arith.mulf %20, %21 : vector<1x64xf32>
    %23 = vector.shape_cast %22 : vector<1x64xf32> to vector<1x1x64xf32>
    %24 = vector.broadcast %23 : vector<1x1x64xf32> to vector<1x16x64xf32>
    %25 = arith.mulf %11, %24 : vector<1x16x64xf32>
    %c0_16 = arith.constant 0 : index
    %c0_17 = arith.constant 0 : index
    %26 = vector.load %arg5[%c0_16, %c0_17] : memref<1x64xf32, #tpu.memory_space<vmem>>, vector<1x64xf32>
    %27 = vector.shape_cast %26 : vector<1x64xf32> to vector<1x1x64xf32>
    %28 = vector.broadcast %27 : vector<1x1x64xf32> to vector<1x16x64xf32>
    %29 = arith.addf %25, %28 : vector<1x16x64xf32>
    %30 = vector.shape_cast %29 : vector<1x16x64xf32> to vector<16x64xf32>
    %31 = arith.truncf %30 : vector<16x64xf32> to vector<16x64xbf16>
    %c0_18 = arith.constant 0 : index
    %c0_19 = arith.constant 0 : index
    %32 = vector.load %arg6[%c0_18, %c0_19] : memref<64x384xbf16, #tpu.memory_space<vmem>>, vector<64x384xbf16>
    %cst_20 = arith.constant dense<0.000000e+00> : vector<16x384xf32>
    %33 = tpu.matmul %31, %32, %cst_20 {dimension_numbers = #tpu.dot_dimension_numbers<[1], [0], [0], [1], [0, 0, 1, 1], [], []>} : vector<16x64xbf16>, vector<64x384xbf16>, vector<16x384xf32> -> vector<16x384xf32>
    %c0_21 = arith.constant 0 : index
    %c0_22 = arith.constant 0 : index
    %34 = vector.load %arg7[%c0_21, %c0_22] : memref<1x384xf32, #tpu.memory_space<vmem>>, vector<1x384xf32>
    %35 = vector.broadcast %34 : vector<1x384xf32> to vector<16x384xf32>
    %36 = arith.addf %33, %35 : vector<16x384xf32>
    %37 = arith.truncf %36 : vector<16x384xf32> to vector<16x384xbf16>
    %38 = vector.shape_cast %37 : vector<16x384xbf16> to vector<1x16x384xbf16>
    %39 = vector.extract_strided_slice %38 {offsets = [0, 0, 0], sizes = [1, 16, 128], strides = [1, 1, 1]} : vector<1x16x384xbf16> to vector<1x16x128xbf16>
    %40 = vector.extract_strided_slice %38 {offsets = [0, 0, 128], sizes = [1, 16, 128], strides = [1, 1, 1]} : vector<1x16x384xbf16> to vector<1x16x128xbf16>
    %41 = vector.extract_strided_slice %38 {offsets = [0, 0, 256], sizes = [1, 16, 128], strides = [1, 1, 1]} : vector<1x16x384xbf16> to vector<1x16x128xbf16>
    %cst_23 = arith.constant dense<0.000000e+00> : vector<1x16x16xf32>
    %42 = tpu.matmul %39, %40, %cst_23 {dimension_numbers = #tpu.dot_dimension_numbers<[2], [2], [1], [1], [0, 0, 0, 1, 1, 1], [0], [0]>} : vector<1x16x128xbf16>, vector<1x16x128xbf16>, vector<1x16x16xf32> -> vector<1x16x16xf32>
    %cst_24 = arith.constant dense<0xFF800000> : vector<1x16xf32>
    %43 = vector.multi_reduction <maximumf>, %42, %cst_24 [2] : vector<1x16x16xf32> to vector<1x16xf32>
    %44 = vector.shape_cast %43 : vector<1x16xf32> to vector<1x16x1xf32>
    %45 = vector.broadcast %44 : vector<1x16x1xf32> to vector<1x16x16xf32>
    %46 = arith.subf %42, %45 : vector<1x16x16xf32>
    %47 = arith.truncf %46 : vector<1x16x16xf32> to vector<1x16x16xbf16>
    %48 = math.exp %47 : vector<1x16x16xbf16>
    %49 = arith.extf %48 : vector<1x16x16xbf16> to vector<1x16x16xf32>
    %cst_25 = arith.constant dense<0.000000e+00> : vector<1x16xf32>
    %50 = vector.multi_reduction <add>, %49, %cst_25 [2] : vector<1x16x16xf32> to vector<1x16xf32>
    %51 = vector.shape_cast %50 : vector<1x16xf32> to vector<1x16x1xf32>
    %cst_26 = arith.constant dense<0.000000e+00> : vector<1x16x128xf32>
    %52 = tpu.matmul %48, %41, %cst_26 {dimension_numbers = #tpu.dot_dimension_numbers<[2], [1], [1], [2], [0, 0, 0, 1, 1, 2], [0], [0]>} : vector<1x16x16xbf16>, vector<1x16x128xbf16>, vector<1x16x128xf32> -> vector<1x16x128xf32>
    %53 = tpu.reciprocal %51 : vector<1x16x1xf32> -> vector<1x16x1xf32>
    %54 = vector.broadcast %53 : vector<1x16x1xf32> to vector<1x16x128xf32>
    %55 = arith.mulf %52, %54 : vector<1x16x128xf32>
    %56 = vector.shape_cast %55 : vector<1x16x128xf32> to vector<16x128xf32>
    %57 = arith.truncf %56 : vector<16x128xf32> to vector<16x128xbf16>
    %c0_27 = arith.constant 0 : index
    %c0_28 = arith.constant 0 : index
    %58 = vector.load %arg8[%c0_27, %c0_28] : memref<128x64xbf16, #tpu.memory_space<vmem>>, vector<128x64xbf16>
    %cst_29 = arith.constant dense<0.000000e+00> : vector<16x64xf32>
    %59 = tpu.matmul %57, %58, %cst_29 {dimension_numbers = #tpu.dot_dimension_numbers<[1], [0], [0], [1], [0, 0, 1, 1], [], []>} : vector<16x128xbf16>, vector<128x64xbf16>, vector<16x64xf32> -> vector<16x64xf32>
    %c0_30 = arith.constant 0 : index
    %c0_31 = arith.constant 0 : index
    %60 = vector.load %arg9[%c0_30, %c0_31] : memref<1x64xf32, #tpu.memory_space<vmem>>, vector<1x64xf32>
    %61 = vector.broadcast %60 : vector<1x64xf32> to vector<16x64xf32>
    %62 = arith.addf %59, %61 : vector<16x64xf32>
    %c0_32 = arith.constant 0 : index
    %c0_33 = arith.constant 0 : index
    %c0_34 = arith.constant 0 : index
    %63 = vector.load %arg1[%c0_32, %c0_33, %c0_34] : memref<1x64x16xf32, #tpu.memory_space<vmem>>, vector<1x64x16xf32>
    %64 = vector.shape_cast %62 : vector<16x64xf32> to vector<1x16x64xf32>
    %65 = tpu.transpose %64, [0, 2, 1] : vector<1x16x64xf32> -> vector<1x64x16xf32>
    %66 = arith.addf %63, %65 : vector<1x64x16xf32>
    %c0_35 = arith.constant 0 : index
    %c0_36 = arith.constant 0 : index
    %c0_37 = arith.constant 0 : index
    %67 = vector.load %arg10[%c0_35, %c0_36, %c0_37] : memref<1x64x16xf32, #tpu.memory_space<vmem>>, vector<1x64x16xf32>
    tpu.vector_store %arg10[%c0_35, %c0_36, %c0_37], %66 {strides = array<i32>} : memref<1x64x16xf32, #tpu.memory_space<vmem>>, vector<1x64x16xf32>,
    return
  }
  func.func @transform_0(%arg0: i32) -> (i32, i32, i32) {
    %c0_i32 = arith.constant 0 : i32
    %c0_i32_0 = arith.constant 0 : i32
    %c0_i32_1 = arith.constant 0 : i32
    return %arg0, %c0_i32, %c0_i32_0 : i32, i32, i32
  }
  func.func @transform_1(%arg0: i32) -> (i32, i32) {
    %c0_i32 = arith.constant 0 : i32
    %c0_i32_0 = arith.constant 0 : i32
    %c0_i32_1 = arith.constant 0 : i32
    return %c0_i32, %c0_i32_0 : i32, i32
  }
  func.func @transform_2(%arg0: i32) -> (i32, i32) {
    %c0_i32 = arith.constant 0 : i32
    %c0_i32_0 = arith.constant 0 : i32
    %c0_i32_1 = arith.constant 0 : i32
    return %c0_i32, %c0_i32_0 : i32, i32
  }
  func.func @transform_3(%arg0: i32) -> (i32, i32) {
    %c0_i32 = arith.constant 0 : i32
    %c0_i32_0 = arith.constant 0 : i32
    %c0_i32_1 = arith.constant 0 : i32
    return %c0_i32, %c0_i32_0 : i32, i32
  }
  func.func @transform_4(%arg0: i32) -> (i32, i32) {
    %c0_i32 = arith.constant 0 : i32
    %c0_i32_0 = arith.constant 0 : i32
    %c0_i32_1 = arith.constant 0 : i32
    return %c0_i32, %c0_i32_0 : i32, i32
  }
  func.func @transform_5(%arg0: i32) -> (i32, i32) {
    %c0_i32 = arith.constant 0 : i32
    %c0_i32_0 = arith.constant 0 : i32
    %c0_i32_1 = arith.constant 0 : i32
    return %c0_i32, %c0_i32_0 : i32, i32
  }
  func.func @transform_6(%arg0: i32) -> (i32, i32) {
    %c0_i32 = arith.constant 0 : i32
    %c0_i32_0 = arith.constant 0 : i32
    %c0_i32_1 = arith.constant 0 : i32
    return %c0_i32, %c0_i32_0 : i32, i32
  }
  func.func @transform_7(%arg0: i32) -> (i32, i32) {
    %c0_i32 = arith.constant 0 : i32
    %c0_i32_0 = arith.constant 0 : i32
    %c0_i32_1 = arith.constant 0 : i32
    return %c0_i32, %c0_i32_0 : i32, i32
  }
  func.func @transform_8(%arg0: i32) -> (i32, i32) {
    %c0_i32 = arith.constant 0 : i32
    %c0_i32_0 = arith.constant 0 : i32
    %c0_i32_1 = arith.constant 0 : i32
    return %c0_i32, %c0_i32_0 : i32, i32
  }
  func.func @transform_9(%arg0: i32) -> (i32, i32, i32) {
    %c0_i32 = arith.constant 0 : i32
    %c0_i32_0 = arith.constant 0 : i32
    %c0_i32_1 = arith.constant 0 : i32
    return %arg0, %c0_i32, %c0_i32_0 : i32, i32, i32
  }
}

</mosaic_0001>

<bundles_post_ra>
// kernel: tpu_custom_call.1
= control target key start
LH: loop header
LB: loop body
LE: loop exit
PB: predicated region body
PF: predicated region fallthrough
CT: control target
= control target key end

     0   :  { %s1575_s30 = smov 0   ;;  %s1828_s0 = inlined_call_operand.vmem [shape: f32[2,64,16], index: 0, kind: input, shape index: {}]   ;;  %s1829_s1 = inlined_call_operand.vmem [shape: f32[64,32], index: 1, kind: input, shape index: {}]   ;;  %s1830_s2 = inlined_call_operand.vmem [shape: f32[32,64], index: 2, kind: input, shape index: {}]   ;;  %s1831_s3 = inlined_call_operand.vmem [shape: f32[1,64], index: 3, kind: input, shape index: {}]   ;;  %s1832_s4 = inlined_call_operand.vmem [shape: f32[1,64], index: 4, kind: input, shape index: {}]   ;;  %s1833_s5 = inlined_call_operand.vmem [shape: bf16[64,384], index: 5, kind: input, shape index: {}]   ;;  %s1834_s6 = inlined_call_operand.vmem [shape: f32[1,384], index: 6, kind: input, shape index: {}]   ;;  %s1835_s7 = inlined_call_operand.vmem [shape: bf16[128,64], index: 7, kind: input, shape index: {}]   ;;  %s1836_s8 = inlined_call_operand.vmem [shape: f32[1,64], index: 8, kind: input, shape index: {}]   ;;  %s1837_s9 = inlined_call_operand.vmem [shape: f32[2,64,16], index: 9, kind: output, shape index: {}]  }
   0x1 LB: > { %s1241_s10 = sadd.s32 4294967295, %s1519_s30   ;;  %p1245_p0 = scmp.ge.s32.totalorder %s1519_s30, 1  ;;  %s1519_s30 = sphi %s1575_s30, %s19_s30  }
   0x2   : > { %p287_p1 = scmp.lt.s32.totalorder %s1519_s30, 3 }
   0x4   : > { %p288_p2 = pnand %p1245_p0, %p287_p1 }
   0x5   : > { %p323_p3 = scmp.lt.s32.totalorder (!%p288_p2), %s1241_s10, 1  ;;  %v1521_v2 = vmov (!%p288_p2), 0.0|0.0   ;;  %v374_v3 = vld [vmem:[%s1829_s1] sm:$0xff] (!%p288_p2)  ;;  %v375_v4 = vld [vmem:[%s1829_s1 + $0x8] sm:$0xff] (!%p288_p2)  ;;  %v376_v7 = vld [vmem:[%s1829_s1 + $0x10] sm:$0xff] (!%p288_p2)  ;;  %vm1522_vm0 = vmmov (!%p288_p2), 0   ;;  %v545_v42 = vlaneseq (!%p288_p2) }
   0x6   : > { %291 = sbr.rel (%p288_p2) target bundleno = 2256 (0x8d0), region = 56  ;;  %1433 = vmatprep.subr.bf16.mxu1 (!%p288_p2), %v1521_v2  ;;  %1463 = vmatprep.subr.bf16.mxu0 (!%p288_p2), %v1521_v2  ;;  %v1608_v5 = vpack.c.bf16 (!%p288_p2), %v375_v4, %v374_v3  ;;  %v377_v8 = vld [vmem:[%s1829_s1 + $0x18] sm:$0xff] (!%p288_p2)  ;;  %v378_v11 = vld [vmem:[%s1829_s1 + $0x20] sm:$0xff] (!%p288_p2)  ;;  %v379_v12 = vld [vmem:[%s1829_s1 + $0x28] sm:$0xff] (!%p288_p2)  ;;  %v1523_v19 = vmov (!%p288_p2), 0.0   ;;  %vm386_vm1 = vcmask (!%p288_p2), 523264  }
   0x7   : > { %v1437_v9 = vpack.c.bf16 (!%p288_p2), %v377_v8, %v376_v7  ;;  %v1440_v13 = vpack.c.bf16 (!%p288_p2), %v379_v12, %v378_v11  ;;  %v380_v15 = vld [vmem:[%s1829_s1 + $0x30] sm:$0xff] (!%p288_p2)  ;;  %v381_v16 = vld [vmem:[%s1829_s1 + $0x38] sm:$0xff] (!%p288_p2)  ;;  %1345 = vmatprep.mubr.msk.f32.mxu1 (!%p288_p2), %vm1522_vm0, %v1523_v19  ;;  %1386 = vmatprep.mubr.msk.f32.mxu0 (!%p288_p2), %vm1522_vm0, %v1523_v19  ;;  %v382_v20 = vld [vmem:[%s1830_s2] sm:$0xff] (!%p288_p2)  ;;  %vm471_vm2 = vcmask (!%p288_p2), 261120   ;;  %v1690_v43 = vshrl.u32 (!%p288_p2), %v545_v42, 7 }
   0x8   : > { %1435 = vmatpush3.bf16.msra.mxu1 (!%p288_p2), %v1608_v5  ;;  %v1443_v17 = vpack.c.bf16 (!%p288_p2), %v381_v16, %v380_v15  ;;  %v383_v21 = vld [vmem:[%s1830_s2 + $0x8] sm:$0xff] (!%p288_p2)  ;;  %v384_v36 = vld [vmem:[%s1830_s2 + $0x10] sm:$0xff] (!%p288_p2)  ;;  %v385_v37 = vld [vmem:[%s1830_s2 + $0x18] sm:$0xff] (!%p288_p2)  ;;  %vm956_vm3 = vcmask (!%p288_p2), 130048  }
   0x9   : > { %1436 = vmatprep.subr.bf16.mxu1 (!%p288_p2), %v1521_v2  ;;  %v1446_v23 = vpack.c.bf16 (!%p288_p2), %v383_v21, %v382_v20  ;;  %v1449_v38 = vpack.c.bf16 (!%p288_p2), %v385_v37, %v384_v36  ;;  %v1693_v44 = vsub.s32 (!%p288_p2), 0, %v1690_v43  ;;  %v1481_v3 = vld [vmem:[%s1833_s5] ss:$12 sps:$4 sm:$0xff] (!%p288_p2)   ;;  %v1484_v4 = vld [vmem:[%s1833_s5 + $0x8] ss:$12 sps:$4 sm:$0xff] (!%p288_p2)   ;;  %v752_v37 = vsub.s32 (!%p288_p2), 1, %v1690_v43 }
   0xa   : > { %v1485_v7 = vld [vmem:[%s1833_s5 + $0x18] ss:$12 sps:$4 sm:$0xff] (!%p288_p2)   ;;  %v1488_v8 = vld [vmem:[%s1833_s5 + $0x20] ss:$12 sps:$4 sm:$0xff] (!%p288_p2)   ;;  %v1489_v11 = vld [vmem:[%s1833_s5 + $0x30] ss:$12 sps:$4 sm:$0xff] (!%p288_p2)  }
   0xb   : > { %1465 = vmatpush3.bf16.msra.mxu0 (!%p288_p2), %v1446_v23  ;;  %v1492_v12 = vld [vmem:[%s1833_s5 + $0x38] ss:$12 sps:$4 sm:$0xff] (!%p288_p2)   ;;  %v1493_v15 = vld [vmem:[%s1833_s5 + $0x48] ss:$12 sps:$4 sm:$0xff] (!%p288_p2)   ;;  %v1496_v16 = vld [vmem:[%s1833_s5 + $0x50] ss:$12 sps:$4 sm:$0xff] (!%p288_p2)  }
   0xc   : > { %1438 = vmatpush3.bf16.msra.mxu1 (!%p288_p2), %v1437_v9  ;;  %1466 = vmatprep.subr.bf16.mxu0 (!%p288_p2), %v1521_v2  ;;  %v744_v36 = vld [vmem:[%s1834_s6] sm:$0x7] (!%p288_p2) }
   0xd   : > { %s1839_s10 = smov (!%p323_p3, %s1241_s10), 1  ;;  %1439 = vmatprep.subr.bf16.mxu1 %v1521_v2  ;;  %v753_v42 = vrot.slane %v744_v36, %v752_v37 }
   0xe   : > { %s1281_s11 = sshll.u32 %s1839_s10, 6 }
   0xf   : > { %s1591_s14 = scalar_lea.vmem %s1828_s0, %s1281_s11  ;;  %1468 = vmatpush3.bf16.msra.mxu0 %v1449_v38 }
  0x10   : > { %v1594_v0 = vld [vmem:[%s1591_s14] sm:$0xff]  ;;  %v1598_v1 = vld [vmem:[%s1591_s14 + $0x8] sm:$0xff]  ;;  %v1612_v6 = vld [vmem:[%s1591_s14 + $0x10] sm:$0xff]  ;;  %1441 = vmatpush3.bf16.msra.mxu1 %v1440_v13 }
  0x11   : > { %342 = vxpose.xlu0.b32.start [1/8] (short) (narrow) %v1594_v0, 16  ;;  %v1624_v10 = vld [vmem:[%s1591_s14 + $0x18] sm:$0xff]  ;;  %v1635_v14 = vld [vmem:[%s1591_s14 + $0x20] sm:$0xff]  ;;  %1442 = vmatprep.subr.bf16.mxu1 %v1521_v2  ;;  %v1646_v18 = vld [vmem:[%s1591_s14 + $0x28] sm:$0xff] }
  0x12   : > { %v1661_v22 = vld [vmem:[%s1591_s14 + $0x30] sm:$0xff]  ;;  %v1666_v24 = vld [vmem:[%s1591_s14 + $0x38] sm:$0xff]  ;;  %s332_s14 = scalar_lea.vmem %s1837_s9, %s1281_s11 }
  0x14   : > { %1444 = vmatpush3.bf16.msra.mxu1 %v1443_v17 }
  0x15   : > { %343 = vxpose.xlu0.b32.cont [2/8] (short) (narrow) %v1598_v1, 16  ;;  %1445 = vmatprep.subr.bf16.mxu1 %v1521_v2 }
  0x19   : > { %344 = vxpose.xlu0.b32.cont [3/8] (short) (narrow) %v1612_v6, 16 }
  0x1d   : > { %345 = vxpose.xlu0.b32.cont [4/8] (short) (narrow) %v1624_v10, 16 }
  0x21   : > { %346 = vxpose.xlu0.b32.cont [5/8] (short) (narrow) %v1635_v14, 16 }
  0x25   : > { %347 = vxpose.xlu0.b32.cont [6/8] (short) (narrow) %v1646_v18, 16 }
  0x29   : > { %348 = vxpose.xlu0.b32.cont [7/8] (short) (narrow) %v1661_v22, 16 }
  0x2d   : > { %349 = vxpose.xlu0.b32.end [8/8] (short) (narrow) %v1666_v24, 16 }
  0x91   : > { %v358_v25 = vpop.trf.xlu0 }
  0x92   : > { %v387_v27 = vsel %vm386_vm1, %v358_v25, 0.0 }
  0x95   : > { %v359_v26 = vpop.trf.xlu0 }
  0x96   : > { %v388_v28 = vsel %vm386_vm1, %v359_v26, 0.0 }
  0x97   : > { %v389_v29 = vadd.f32 %v388_v28, %v387_v27 }
  0x99   : > { %v390_v30 = vrot.slane %v389_v29, 4 }
  0x9b   : > { %v391_v31 = vadd.f32 %v390_v30, %v389_v29  ;;  %v1254_v29 = vld [vmem:[%s1832_s4] ss:$0 sm:$0xff] }
  0x9d   : > { %v392_v32 = vrot.slane %v391_v31, 2 }
  0x9f   : > { %v393_v33 = vadd.f32 %v392_v32, %v391_v31 }
  0xa1   : > { %v394_v34 = vrot.slane %v393_v33, 1 }
  0xa3   : > { %v395_v35 = vadd.f32 %v394_v34, %v393_v33 }
  0xa5   : > { %1346 = vmatmul.mubr.msk.f32.vlgmr.msra.gmra.mrb[0].mxu1 %vm386_vm1, %v395_v35  ;;  %v756_v35 = vsub.s32 2, %v1690_v43 }
  0xa6   : > { %1447 = vmatpush3.bf16.msra.mxu1 %v1446_v23  ;;  %1356 = vmatprep.mubr.msk.f32.mxu1 %vm1522_vm0, %v1523_v19 }
  0xa7   : > { %1448 = vmatprep.subr.bf16.mxu1 %v1521_v2 }
  0xaa   : > { %1450 = vmatpush3.bf16.msra.mxu1 %v1449_v38  ;;  %v749_v38 = vrot.slane %v744_v36, %v1693_v44 }
  0xab   : > { %1451 = vmatprep.subr.bf16.mxu1 %v1521_v2 }
 0x178   : > { %v465_v39 = vpop.f32.mrb[0].mxu1 }
 0x179   : > { %v470_v40 = vmul.f32 0.03125, %v465_v39  ;;  %v1347_v41 = vpop.f32.mrb[1].mxu1  ;;  %v757_v39 = vrot.slane %v744_v36, %v756_v35 }
 0x17b   : > { %1357 = vmatmul.mubr.msk.f32.vlgmr.msra.gmra.mrb[2].mxu1 %vm471_vm2, %v470_v40 }
 0x17c   : > { %1453 = vmatpush3.bf16.msra.mxu1 %v1608_v5  ;;  %1375 = vmatprep.mubr.msk.f32.mxu1 %vm1522_vm0, %v1523_v19  ;;  %v1487_v5 = vld [vmem:[%s1833_s5 + $0x1c] ss:$12 sps:$4 sm:$0xff]  }
 0x17d   : > { %1454 = vmatprep.subr.bf16.mxu1 %v1521_v2 }
 0x180   : > { %1456 = vmatpush3.bf16.msra.mxu1 %v1437_v9  ;;  %v1491_v9 = vld [vmem:[%s1833_s5 + $0x34] ss:$12 sps:$4 sm:$0xff]  }
 0x181   : > { %1457 = vmatprep.subr.bf16.mxu1 %v1521_v2 }
 0x184   : > { %1459 = vmatpush3.bf16.msra.mxu1 %v1440_v13  ;;  %v1495_v13 = vld [vmem:[%s1833_s5 + $0x4c] ss:$12 sps:$4 sm:$0xff]  }
 0x185   : > { %1460 = vmatprep.subr.bf16.mxu1 %v1521_v2  ;;  %v1483_v2 = vld [vmem:[%s1833_s5 + $0x4] ss:$12 sps:$4 sm:$0xff]  }
 0x186   : > { %828 = vmatprep.subr.bf16.mxu0 %v1483_v2 }
 0x188   : > { %1462 = vmatpush3.bf16.msra.mxu1 %v1443_v17  ;;  %v1524_v17 = vmov 0  }
 0x189   : > { %1389 = vmatprep.subr.bf16.mxu1 %v1523_v19 }
 0x24e   : > { %v541_v45 = vpop.f32.mrb[2].mxu1 }
 0x24f   : > { %v548_v46 = vrot.slane %v541_v45, %v1693_v44  ;;  %v1358_v47 = vpop.f32.mrb[3].mxu1 }
 0x251   : > { %v549_v48 = vsub.f32 %v358_v25, %v548_v46  ;;  %v550_v49 = vsub.f32 %v359_v26, %v548_v46  ;;  %v710_v25 = vld [vmem:[%s1831_s3] sm:$0x1] }
 0x253   : > { %v551_v50 = vmul.f32 %v549_v48, %v549_v48  ;;  %v552_v51 = vmul.f32 %v550_v49, %v550_v49 }
 0x255   : > { %v553_v52 = vsel %vm386_vm1, %v551_v50, 0.0  ;;  %v554_v53 = vsel %vm386_vm1, %v552_v51, 0.0 }
 0x256   : > { %v555_v54 = vadd.f32 %v554_v53, %v553_v52 }
 0x258   : > { %v556_v55 = vrot.slane %v555_v54, 4 }
 0x25a   : > { %v557_v56 = vadd.f32 %v556_v55, %v555_v54 }
 0x25c   : > { %v558_v57 = vrot.slane %v557_v56, 2 }
 0x25e   : > { %v559_v58 = vadd.f32 %v558_v57, %v557_v56 }
 0x260   : > { %v560_v59 = vrot.slane %v559_v58, 1 }
 0x262   : > { %v561_v60 = vadd.f32 %v560_v59, %v559_v58 }
 0x264   : > { %1376 = vmatmul.mubr.msk.f32.vlgmr.msra.gmra.mrb[4].mxu1 %vm386_vm1, %v561_v60 }
 0x265   : > { %1397 = vmatprep.mubr.msk.bf16.mxu1 %vm1522_vm0, %v1523_v19  ;;  %1390 = vmatpush3.bf16.msra.mxu1 %v1484_v4 }
 0x266   : > { %1391 = vmatprep.subr.bf16.mxu1 %v1523_v19 }
 0x269   : > { %1392 = vmatpush3.bf16.msra.mxu1 %v1488_v8 }
 0x26a   : > { %1393 = vmatprep.subr.bf16.mxu1 %v1523_v19 }
 0x26d   : > { %1394 = vmatpush3.bf16.msra.mxu1 %v1492_v12 }
 0x26e   : > { %1395 = vmatprep.subr.bf16.mxu1 %v1523_v19 }
 0x271   : > { %1396 = vmatpush3.bf16.msra.mxu1 %v1496_v16  ;;  %v1497_v16 = vld [vmem:[%s1835_s7] sm:$0xff]  }
 0x272   : > { %1407 = vmatprep.subr.bf16.mxu1 %v1523_v19 }
 0x337   : > { %v631_v61 = vpop.f32.mrb[4].mxu1 }
 0x338   : > { %v635_v62 = vmul.f32 0.03125, %v631_v61  ;;  %v1377_v63 = vpop.f32.mrb[5].mxu1 }
 0x33a   : > { %1387 = vmatmul.mubr.msk.f32.vlgmr.msra.gmra.mrb[0].mxu0 %vm471_vm2, %v635_v62 }
 0x33b   : > { %829 = vmatpush1.bf16.msra.mxu0 %v1481_v3  ;;  %860 = vmatprep.mubr.bf16.mxu0 %v1524_v17  ;;  %v1498_v17 = vld [vmem:[%s1835_s7 + $0x8] sm:$0xff]  }
 0x33c   : > { %830 = vmatprep.subr.bf16.mxu0 %v1487_v5 }
 0x33f   : > { %831 = vmatpush1.bf16.msra.mxu0 %v1485_v7 }
 0x340   : > { %832 = vmatprep.subr.bf16.mxu0 %v1491_v9 }
 0x343   : > { %833 = vmatpush1.bf16.msra.mxu0 %v1489_v11 }
 0x344   : > { %834 = vmatprep.subr.bf16.mxu0 %v1495_v13 }
 0x347   : > { %835 = vmatpush1.bf16.msra.mxu0 %v1493_v15 }
 0x348   : > { %1401 = vmatprep.subr.bf16.mxu0 %v1523_v19 }
 0x40d   : > { %v705_v20 = vpop.f32.mrb[0].mxu0 }
 0x40e   : > { %v706_v21 = vadd.f32 1e-06, %v705_v20  ;;  %v1388_v23 = vpop.f32.mrb[1].mxu0  ;;  %v1499_v20 = vld [vmem:[%s1835_s7 + $0x10] sm:$0xff]  }
 0x40f   : > { %v1501_v23 = vld [vmem:[%s1835_s7 + $0x20] sm:$0xff]  }
 0x410   : > { %1505 = vrsqrt.f32 %v706_v21  ;;  %v1500_v21 = vld [vmem:[%s1835_s7 + $0x18] sm:$0xff]  }
 0x41a   : > { %v1506_v26 = vpop.eup %1505 }
 0x41b   : > { %v711_v27 = vmul.f32 %v1506_v26, %v710_v25  ;;  %v1502_v25 = vld [vmem:[%s1835_s7 + $0x28] sm:$0xff]   ;;  %v1503_v26 = vld [vmem:[%s1835_s7 + $0x30] sm:$0xff]  }
 0x41d   : > { %v715_v28 = vrot.slane %v711_v27, %v1693_v44  ;;  %v1504_v27 = vld [vmem:[%s1835_s7 + $0x38] sm:$0xff]  }
 0x41f   : > { %v716_v30 = vmul.f32 %v715_v28, %v549_v48  ;;  %v717_v31 = vmul.f32 %v715_v28, %v550_v49 }
 0x421   : > { %v725_v32 = vadd.f32 %v1254_v29, %v716_v30  ;;  %v726_v33 = vadd.f32 %v1254_v29, %v717_v31 }
 0x423   : > { %v727_v34 = vpack.c.bf16 %v726_v33, %v725_v32 }
 0x425   : > { %1267 = vmatmul.mubr.msk.bf16.vlgmr.msra.gmra.mrb[4].mxu0 %vm386_vm1, %v727_v34  ;;  %1398 = vmatmul.mubr.msk.bf16.vlgmr.msra.gmra.mrb[8].mxu1 %vm386_vm1, %v727_v34 }
 0x426   : > { %1403 = vmatprep.mubr.msk.bf16.mxu0 %vm1522_vm0, %v1523_v19  ;;  %1409 = vmatprep.mubr.msk.bf16.mxu1 %vm1522_vm0, %v1523_v19 }
 0x4f8   : > { %v862_v40 = vpop.f32.mrb[4].mxu0  ;;  %v905_v41 = vpop.f32.mrb[8].mxu1 }
 0x4f9   : > { %v864_v45 = vpop.f32.mrb[5].mxu0  ;;  %v1399_v46 = vpop.f32.mrb[9].mxu1  ;;  %v863_v49 = vadd.f32 %v862_v40, %v749_v38  ;;  %v906_v50 = vadd.f32 %v905_v41, %v757_v39 }
 0x4fa   : > { %v866_v47 = vpop.f32.mrb[6].mxu0  ;;  %v908_v48 = vpop.f32.mrb[10].mxu1  ;;  %v865_v55 = vadd.f32 %v864_v45, %v753_v42 }
 0x4fb   : > { %v867_v51 = vadd.f32 %v866_v47, %v749_v38  ;;  %v909_v52 = vadd.f32 %v908_v48, %v757_v39  ;;  %v868_v53 = vpop.f32.mrb[7].mxu0  ;;  %v1400_v54 = vpop.f32.mrb[11].mxu1 }
 0x4fc   : > { %v869_v56 = vadd.f32 %v868_v53, %v753_v42 }
 0x4fd   : > { %v912_v57 = vpack.c.bf16 %v867_v51, %v863_v49  ;;  %v914_v43 = vpack.c.bf16 %v909_v52, %v906_v50 }
 0x4fe   : > { %v913_v58 = vpack.c.bf16 %v869_v56, %v865_v55 }
 0x4ff   : > { %1408 = vmatpush3.bf16.msra.mxu1 %v914_v43 }
 0x500   : > { %1402 = vmatpush3.bf16.xpose.msra.mxu0 %v913_v58 }
 0x501   : > { %1413 = vmatprep.subr.bf16.mxu0 %v1523_v19 }
 0x507   : > { %1404 = vmatmul.mubr.bf16.vlgmr.msra.gmra.mrb[8].mxu0 %v912_v57 }
 0x508   : > { %1429 = vmatprep.mubr.msk.bf16.mxu0 %vm1522_vm0, %v1523_v19  ;;  %1414 = vmatpush3.bf16.msra.mxu0 %v1497_v16 }
 0x509   : > { %1415 = vmatprep.subr.bf16.mxu0 %v1523_v19 }
 0x50c   : > { %1416 = vmatpush3.bf16.msra.mxu0 %v1498_v17 }
 0x50d   : > { %1417 = vmatprep.subr.bf16.mxu0 %v1523_v19 }
 0x510   : > { %1418 = vmatpush3.bf16.msra.mxu0 %v1499_v20 }
 0x511   : > { %1419 = vmatprep.subr.bf16.mxu0 %v1523_v19 }
 0x514   : > { %1420 = vmatpush3.bf16.msra.mxu0 %v1500_v21 }
 0x515   : > { %1421 = vmatprep.subr.bf16.mxu0 %v1523_v19 }
 0x518   : > { %1422 = vmatpush3.bf16.msra.mxu0 %v1501_v23 }
 0x519   : > { %1423 = vmatprep.subr.bf16.mxu0 %v1523_v19 }
 0x51c   : > { %1424 = vmatpush3.bf16.msra.mxu0 %v1502_v25 }
 0x51d   : > { %1425 = vmatprep.subr.bf16.mxu0 %v1523_v19 }
 0x520   : > { %1426 = vmatpush3.bf16.msra.mxu0 %v1503_v26 }
 0x521   : > { %1427 = vmatprep.subr.bf16.mxu0 %v1523_v19  ;;  %v1270_v19 = vld [vmem:[%s1836_s8] ss:$0 sm:$0xff] }
 0x524   : > { %1428 = vmatpush3.bf16.msra.mxu0 %v1504_v27 }
 0x5da   : > { %v949_v44 = vpop.f32.mrb[8].mxu0 }
 0x5db   : > { %v1405_v59 = vpop.f32.mrb[9].mxu0  ;;  %v957_v60 = vsel %vm956_vm3, %v949_v44, -inf }
 0x5dc   : > { %958 = vmax.xlane.f32.xlu1 %v957_v60  ;;  %v952_v61 = vpop.f32.mrb[10].mxu0 }
 0x5dd   : > { %v1406_v62 = vpop.f32.mrb[11].mxu0  ;;  %v960_v63 = vsel %vm956_vm3, %v952_v61, -inf }
 0x5e0   : > { %961 = vmax.xlane.f32.xlu1 %v960_v63 }
 0x669   : > { %v959_v2 = vpop.xlane.xlu1 %958 }
 0x66a   : > { %v963_v4 = vsub.f32 %v949_v44, %v959_v2 }
 0x66d   : > { %v962_v3 = vpop.xlane.xlu1 %961 }
 0x66e   : > { %v964_v5 = vsub.f32 %v952_v61, %v962_v3 }
 0x670   : > { %v965_v7 = vpack.c.bf16 %v964_v5, %v963_v4 }
 0x672   : > { %v967_v8 = vmul.bf16 1069105081, %v965_v7 }
 0x674   : > { %1507 = vpow.bf16 %v967_v8 }
 0x67f   : > { %v1508_v9 = vpop.eup %1507 }
 0x680   : > { %1410 = vmatmul.mubr.msk.bf16.vlgmr.msra.gmra.mrb[12].mxu1 %vm956_vm3, %v1508_v9  ;;  %v969_v11 = vunpack.c.l.bf16 %v1508_v9  ;;  %v970_v13 = vunpack.c.h.bf16 %v1508_v9 }
 0x682   : > { %v971_v12 = vsel %vm956_vm3, %v969_v11, 0.0  ;;  %v974_v15 = vsel %vm956_vm3, %v970_v13, 0.0 }
 0x683   : > { %972 = vadd.xlane.f32.xlu1 %v971_v12 }
 0x687   : > { %975 = vadd.xlane.f32.xlu1 %v974_v15 }
 0x710   : > { %v973_v28 = vpop.xlane.xlu1 %972 }
 0x711   : > { %1509 = vrcp.f32 %v973_v28 }
 0x714   : > { %v976_v29 = vpop.xlane.xlu1 %975 }
 0x715   : > { %1511 = vrcp.f32 %v976_v29 }
 0x71b   : > { %v1510_v31 = vpop.eup %1509 }
 0x71f   : > { %v1512_v33 = vpop.eup %1511 }
 0x753   : > { %v1014_v30 = vpop.f32.mrb[12].mxu1 }
 0x754   : > { %v1411_v32 = vpop.f32.mrb[13].mxu1  ;;  %v1023_v35 = vmul.f32 %v1510_v31, %v1014_v30 }
 0x755   : > { %v1017_v34 = vpop.f32.mrb[14].mxu1 }
 0x756   : > { %v1024_v36 = vmul.f32 %v1512_v33, %v1017_v34  ;;  %v1412_v37 = vpop.f32.mrb[15].mxu1 }
 0x758   : > { %v1025_v38 = vpack.c.bf16 %v1024_v36, %v1023_v35 }
 0x75a   : > { %1430 = vmatmul.mubr.bf16.vlgmr.msra.gmra.mrb[12].mxu0 %v1025_v38 }
 0x82d   : > { %v1131_v39 = vpop.f32.mrb[12].mxu0 }
 0x82e   : > { %v1132_v40 = vadd.f32 %v1270_v19, %v1131_v39  ;;  %v1431_v41 = vpop.f32.mrb[13].mxu0 }
 0x82f   : > { %v1134_v42 = vpop.f32.mrb[14].mxu0 }
 0x830   : > { %1138 = vxpose.xlu1.b32.start [1/2] (short) (narrow) %v1132_v40, 64  ;;  %v1432_v45 = vpop.f32.mrb[15].mxu0  ;;  %v1135_v46 = vadd.f32 %v1270_v19, %v1134_v42 }
 0x834   : > { %1139 = vxpose.xlu1.b32.end [2/2] (short) (narrow) %v1135_v46, 64 }
 0x8b0   : > { %v1154_v47 = vpop.trf.xlu1 }
 0x8b1   : > { %v1170_v48 = vadd.f32 %v1154_v47, %v1594_v0 }
 0x8b3   : > { %1178 = vst.msk [vmem:[%s332_s14] sm:$0xff] %vm956_vm3, %v1170_v48 }
 0x8b4   : > { %v1155_v49 = vpop.trf.xlu1 }
 0x8b5   : > { %v1171_v50 = vadd.f32 %v1155_v49, %v1598_v1 }
 0x8b7   : > { %1179 = vst.msk [vmem:[%s332_s14 + $0x8] sm:$0xff] %vm956_vm3, %v1171_v50 }
 0x8b8   : > { %v1156_v51 = vpop.trf.xlu1 }
 0x8b9   : > { %v1172_v52 = vadd.f32 %v1156_v51, %v1612_v6 }
 0x8bb   : > { %1180 = vst.msk [vmem:[%s332_s14 + $0x10] sm:$0xff] %vm956_vm3, %v1172_v52 }
 0x8bc   : > { %v1157_v53 = vpop.trf.xlu1 }
 0x8bd   : > { %v1173_v54 = vadd.f32 %v1157_v53, %v1624_v10 }
 0x8bf   : > { %1181 = vst.msk [vmem:[%s332_s14 + $0x18] sm:$0xff] %vm956_vm3, %v1173_v54 }
 0x8c0   : > { %v1158_v55 = vpop.trf.xlu1 }
 0x8c1   : > { %v1174_v0 = vadd.f32 %v1158_v55, %v1635_v14 }
 0x8c3   : > { %1182 = vst.msk [vmem:[%s332_s14 + $0x20] sm:$0xff] %vm956_vm3, %v1174_v0 }
 0x8c4   : > { %v1159_v56 = vpop.trf.xlu1 }
 0x8c5   : > { %v1175_v1 = vadd.f32 %v1159_v56, %v1646_v18 }
 0x8c7   : > { %1183 = vst.msk [vmem:[%s332_s14 + $0x28] sm:$0xff] %vm956_vm3, %v1175_v1 }
 0x8c8   : > { %v1160_v57 = vpop.trf.xlu1 }
 0x8c9   : > { %v1176_v6 = vadd.f32 %v1160_v57, %v1661_v22 }
 0x8cb   : > { %1184 = vst.msk [vmem:[%s332_s14 + $0x30] sm:$0xff] %vm956_vm3, %v1176_v6 }
 0x8cc   : > { %v1161_v43 = vpop.trf.xlu1 }
 0x8cd   : > { %v1177_v10 = vadd.f32 %v1161_v43, %v1666_v24 }
 0x8cf   : > { %1185 = vst.msk [vmem:[%s332_s14 + $0x38] sm:$0xff] %vm956_vm3, %v1177_v10 }
 0x8d0 PF: > { %s19_s30 = sadd.s32 1, %s1519_s30  }
 0x8d1   : > { %p16_p4 = scmp.ge.s32.totalorder %s19_s30, 4  }
 0x8d3   :  { %18 = sbr.rel (!%p16_p4) target bundleno = 1 (0x1), region = 86 }

</bundles_post_ra>
